<compile_context>
chip_gen: v6e
topology: v6e:2x2x1
jax: 0.10.0
libtpu: 0.0.40
codegen_flags: <defaults>
</compile_context>

<pallas_src>
import functools

import jax
import jax.numpy as jnp
from jax.experimental import pallas as pl
from jax.experimental.pallas import tpu as pltpu

EPS = 1e-5
LANES = 128

# ---- packed-parameter slab layout (rows of a (520, 128) f32 buffer) --------
_W_IN, _W_FC1, _W_FC2, _W_OUT = 0, 128, 256, 384   # each weight padded (128,128)
_VECS = 512                                        # 8 rows of (1,128) vectors
_SLAB_ROWS = _VECS + 8
# vector row order inside the vec block
_B_IN, _G1, _BE1, _B_FC1, _G2, _BE2, _B_FC2, _B_OUT = range(8)

# true layer dims (in, out)
_DIMS = {"input": (11, 16), "fc1": (16, 32), "fc2": (32, 20), "output": (20, 1)}


def wine_kernel(x_ref, p_ref, o_ref, *, do_batch_norm: bool):
    x = x_ref[...]                                   # (B, 128), lanes >= 11 are zero

    vecs = p_ref[_VECS:_VECS + 8, :]                 # (8, 128) -> all 1-row vectors

    def linear(h, w_row0, bias_row):
        w = p_ref[w_row0:w_row0 + LANES, :]          # (128, 128), zero-padded
        b = vecs[bias_row:bias_row + 1, :]           # (1, 128),  zero-padded
        return jnp.dot(h, w, preferred_element_type=jnp.float32) + b

    def batchnorm(h, g_row, b_row):
        # Fused single-pass stats: reduce lane-concatenated [h, h*h] over batch.
        stats = jnp.mean(jnp.concatenate([h, h * h], axis=1),
                         axis=0, keepdims=True)      # (1, 256)
        mu, ms = stats[:, :LANES], stats[:, LANES:]
        var = jnp.maximum(ms - mu * mu, 0.0)         # biased variance
        gamma = vecs[g_row:g_row + 1, :]
        beta = vecs[b_row:b_row + 1, :]
        scale = gamma * jax.lax.rsqrt(var + EPS)
        shift = beta - mu * scale
        return h * scale + shift                     # padded lanes stay exactly 0

    # data = relu(self.input(data))
    h = jnp.maximum(linear(x, _W_IN, _B_IN), 0.0)
    if do_batch_norm:
        h = batchnorm(h, _G1, _BE1)                  # self.bNorm1
    # data = relu(self.fc1(data))
    h = jnp.maximum(linear(h, _W_FC1, _B_FC1), 0.0)
    if do_batch_norm:
        h = batchnorm(h, _G2, _BE2)                  # self.bNorm2
    # data = relu(self.fc2(data))
    h = jnp.maximum(linear(h, _W_FC2, _B_FC2), 0.0)

    # return self.output(data)  -- lane-dense (B, 128) store; only col 0 is live
    o_ref[...] = linear(h, _W_OUT, _B_OUT)


def init_params(key):
    """Deterministic parameter init matching the PyTorch module's shapes."""
    params = {}
    for name, (fan_in, fan_out) in _DIMS.items():
        key, kw, kb = jax.random.split(key, 3)
        bound = 1.0 / jnp.sqrt(fan_in)
        # stored pre-transposed: (in, out)
        params[f"{name}_w"] = jax.random.uniform(
            kw, (fan_in, fan_out), jnp.float32, -bound, bound)
        params[f"{name}_b"] = jax.random.uniform(
            kb, (1, fan_out), jnp.float32, -bound, bound)
    # BatchNorm affine params: PyTorch default init (gamma=1, beta=0)
    params["bn1_gamma"] = jnp.ones((1, 16), jnp.float32)
    params["bn1_beta"] = jnp.zeros((1, 16), jnp.float32)
    params["bn2_gamma"] = jnp.ones((1, 32), jnp.float32)
    params["bn2_beta"] = jnp.zeros((1, 32), jnp.float32)
    return params


def pack_params(params):
    """Pack all 13 parameter arrays into one zero-padded (520, 128) f32 slab."""
    slab = jnp.zeros((_SLAB_ROWS, LANES), jnp.float32)

    def put_w(s, row0, w):
        r, c = w.shape
        return s.at[row0:row0 + r, :c].set(w)

    def put_v(s, row, v):
        v = v.reshape(-1)
        return s.at[_VECS + row, :v.shape[0]].set(v)

    slab = put_w(slab, _W_IN, params["input_w"])
    slab = put_w(slab, _W_FC1, params["fc1_w"])
    slab = put_w(slab, _W_FC2, params["fc2_w"])
    slab = put_w(slab, _W_OUT, params["output_w"])
    slab = put_v(slab, _B_IN, params["input_b"])
    slab = put_v(slab, _G1, params["bn1_gamma"])
    slab = put_v(slab, _BE1, params["bn1_beta"])
    slab = put_v(slab, _B_FC1, params["fc1_b"])
    slab = put_v(slab, _G2, params["bn2_gamma"])
    slab = put_v(slab, _BE2, params["bn2_beta"])
    slab = put_v(slab, _B_FC2, params["fc2_b"])
    slab = put_v(slab, _B_OUT, params["output_b"])
    return slab


def wine_forward(x, slab, do_batch_norm: bool):
    B, F = x.shape
    # lane-dense, zero-padded input (padded lanes hit zero weight rows anyway)
    x_pad = jnp.zeros((B, LANES), jnp.float32).at[:, :F].set(x)

    real_flops = 2 * B * sum(i * o for i, o in _DIMS.values())
    bn_flops = (10 * B * LANES * 2) if do_batch_norm else 0
    cost = pl.CostEstimate(
        flops=real_flops + bn_flops,
        transcendentals=(2 * LANES) if do_batch_norm else 0,
        bytes_accessed=(x_pad.size + slab.size + B * LANES) * 4,
    )

    out = pl.pallas_call(
        functools.partial(wine_kernel, do_batch_norm=do_batch_norm),
        out_shape=jax.ShapeDtypeStruct((B, LANES), jnp.float32),
        in_specs=[pl.BlockSpec(memory_space=pltpu.MemorySpace.VMEM)] * 2,
        out_specs=pl.BlockSpec(memory_space=pltpu.MemorySpace.VMEM),
        cost_estimate=cost,
    )(x_pad, slab)
    return out[:, :1]


def wine_forward_ref(x, params, do_batch_norm: bool):
    """Pure-JAX reference mirroring the PyTorch forward (train-mode BN)."""
    h = jnp.maximum(x @ params["input_w"] + params["input_b"], 0.0)
    if do_batch_norm:
        mu = h.mean(0, keepdims=True)
        var = ((h - mu) ** 2).mean(0, keepdims=True)
        h = (h - mu) / jnp.sqrt(var + EPS) * params["bn1_gamma"] + params["bn1_beta"]
    h = jnp.maximum(h @ params["fc1_w"] + params["fc1_b"], 0.0)
    if do_batch_norm:
        mu = h.mean(0, keepdims=True)
        var = ((h - mu) ** 2).mean(0, keepdims=True)
        h = (h - mu) / jnp.sqrt(var + EPS) * params["bn2_gamma"] + params["bn2_beta"]
    h = jnp.maximum(h @ params["fc2_w"] + params["fc2_b"], 0.0)
    return h @ params["output_w"] + params["output_b"]


if __name__ == "__main__":
    key = jax.random.PRNGKey(0)
    key, kx = jax.random.split(key)
    B = 8
    x = jax.random.normal(kx, (B, 11), jnp.float32)   # wine data: 11 features
    params = init_params(key)
    slab = pack_params(params)

    ok = True
    for do_bn in (True, False):
        out = jax.block_until_ready(wine_forward(x, slab, do_bn))
        ref = wine_forward_ref(x, params, do_bn)
        assert out.shape == (B, 1)
        ok &= bool(jnp.allclose(out, ref, atol=1e-5, rtol=1e-5))

    if ok:
        print("KERNEL_OK")
</pallas_src>

<mosaic_0001>
module attributes {stable_mosaic.version = 11 : i64} {
  func.func @wine_kernel(%arg0: memref<8x128xf32, #tpu.memory_space<vmem>>, %arg1: memref<520x128xf32, #tpu.memory_space<vmem>>, %arg2: memref<8x128xf32, #tpu.memory_space<vmem>>) attributes {dimension_semantics = [], scalar_prefetch = 0 : i64, scratch_operands = 0 : i64, tpu.core_type = #tpu.core_type<tc>} {
    %c0 = arith.constant 0 : index
    %c0_0 = arith.constant 0 : index
    %0 = vector.load %arg0[%c0, %c0_0] : memref<8x128xf32, #tpu.memory_space<vmem>>, vector<8x128xf32>
    %c512 = arith.constant 512 : index
    %c0_1 = arith.constant 0 : index
    %1 = vector.load %arg1[%c512, %c0_1] : memref<520x128xf32, #tpu.memory_space<vmem>>, vector<8x128xf32>
    %c0_2 = arith.constant 0 : index
    %c0_3 = arith.constant 0 : index
    %2 = vector.load %arg1[%c0_2, %c0_3] : memref<520x128xf32, #tpu.memory_space<vmem>>, vector<128x128xf32>
    %3 = vector.extract_strided_slice %1 {offsets = [0, 0], sizes = [1, 128], strides = [1, 1]} : vector<8x128xf32> to vector<1x128xf32>
    %cst = arith.constant dense<0.000000e+00> : vector<8x128xf32>
    %4 = tpu.matmul %0, %2, %cst {dimension_numbers = #tpu.dot_dimension_numbers<[1], [0], [0], [1], [0, 0, 1, 1], [], []>} : vector<8x128xf32>, vector<128x128xf32>, vector<8x128xf32> -> vector<8x128xf32>
    %5 = vector.broadcast %3 : vector<1x128xf32> to vector<8x128xf32>
    %6 = arith.addf %4, %5 : vector<8x128xf32>
    %cst_4 = arith.constant 0.000000e+00 : f32
    %7 = vector.broadcast %cst_4 : f32 to vector<8x128xf32>
    %8 = arith.maximumf %6, %7 : vector<8x128xf32>
    %9 = arith.mulf %8, %8 : vector<8x128xf32>
    %10 = tpu.concatenate %8, %9 in 1 : vector<8x128xf32>, vector<8x128xf32> -> vector<8x256xf32>
    %cst_5 = arith.constant dense<0.000000e+00> : vector<256xf32>
    %11 = vector.multi_reduction <add>, %10, %cst_5 [0] : vector<8x256xf32> to vector<256xf32>
    %12 = vector.shape_cast %11 : vector<256xf32> to vector<1x256xf32>
    %cst_6 = arith.constant 8.000000e+00 : f32
    %13 = vector.broadcast %cst_6 : f32 to vector<1x256xf32>
    %14 = arith.divf %12, %13 : vector<1x256xf32>
    %15 = vector.extract_strided_slice %14 {offsets = [0, 0], sizes = [1, 128], strides = [1, 1]} : vector<1x256xf32> to vector<1x128xf32>
    %16 = vector.extract_strided_slice %14 {offsets = [0, 128], sizes = [1, 128], strides = [1, 1]} : vector<1x256xf32> to vector<1x128xf32>
    %17 = arith.mulf %15, %15 : vector<1x128xf32>
    %18 = arith.subf %16, %17 : vector<1x128xf32>
    %cst_7 = arith.constant 0.000000e+00 : f32
    %19 = vector.broadcast %cst_7 : f32 to vector<1x128xf32>
    %20 = arith.maximumf %18, %19 : vector<1x128xf32>
    %21 = vector.extract_strided_slice %1 {offsets = [1, 0], sizes = [1, 128], strides = [1, 1]} : vector<8x128xf32> to vector<1x128xf32>
    %22 = vector.extract_strided_slice %1 {offsets = [2, 0], sizes = [1, 128], strides = [1, 1]} : vector<8x128xf32> to vector<1x128xf32>
    %cst_8 = arith.constant 9.99999974E-6 : f32
    %23 = vector.broadcast %cst_8 : f32 to vector<1x128xf32>
    %24 = arith.addf %20, %23 : vector<1x128xf32>
    %25 = math.rsqrt %24 : vector<1x128xf32>
    %26 = arith.mulf %21, %25 : vector<1x128xf32>
    %27 = arith.mulf %15, %26 : vector<1x128xf32>
    %28 = arith.subf %22, %27 : vector<1x128xf32>
    %29 = vector.broadcast %26 : vector<1x128xf32> to vector<8x128xf32>
    %30 = arith.mulf %8, %29 : vector<8x128xf32>
    %31 = vector.broadcast %28 : vector<1x128xf32> to vector<8x128xf32>
    %32 = arith.addf %30, %31 : vector<8x128xf32>
    %c128 = arith.constant 128 : index
    %c0_9 = arith.constant 0 : index
    %33 = vector.load %arg1[%c128, %c0_9] : memref<520x128xf32, #tpu.memory_space<vmem>>, vector<128x128xf32>
    %34 = vector.extract_strided_slice %1 {offsets = [3, 0], sizes = [1, 128], strides = [1, 1]} : vector<8x128xf32> to vector<1x128xf32>
    %cst_10 = arith.constant dense<0.000000e+00> : vector<8x128xf32>
    %35 = tpu.matmul %32, %33, %cst_10 {dimension_numbers = #tpu.dot_dimension_numbers<[1], [0], [0], [1], [0, 0, 1, 1], [], []>} : vector<8x128xf32>, vector<128x128xf32>, vector<8x128xf32> -> vector<8x128xf32>
    %36 = vector.broadcast %34 : vector<1x128xf32> to vector<8x128xf32>
    %37 = arith.addf %35, %36 : vector<8x128xf32>
    %cst_11 = arith.constant 0.000000e+00 : f32
    %38 = vector.broadcast %cst_11 : f32 to vector<8x128xf32>
    %39 = arith.maximumf %37, %38 : vector<8x128xf32>
    %40 = arith.mulf %39, %39 : vector<8x128xf32>
    %41 = tpu.concatenate %39, %40 in 1 : vector<8x128xf32>, vector<8x128xf32> -> vector<8x256xf32>
    %cst_12 = arith.constant dense<0.000000e+00> : vector<256xf32>
    %42 = vector.multi_reduction <add>, %41, %cst_12 [0] : vector<8x256xf32> to vector<256xf32>
    %43 = vector.shape_cast %42 : vector<256xf32> to vector<1x256xf32>
    %cst_13 = arith.constant 8.000000e+00 : f32
    %44 = vector.broadcast %cst_13 : f32 to vector<1x256xf32>
    %45 = arith.divf %43, %44 : vector<1x256xf32>
    %46 = vector.extract_strided_slice %45 {offsets = [0, 0], sizes = [1, 128], strides = [1, 1]} : vector<1x256xf32> to vector<1x128xf32>
    %47 = vector.extract_strided_slice %45 {offsets = [0, 128], sizes = [1, 128], strides = [1, 1]} : vector<1x256xf32> to vector<1x128xf32>
    %48 = arith.mulf %46, %46 : vector<1x128xf32>
    %49 = arith.subf %47, %48 : vector<1x128xf32>
    %cst_14 = arith.constant 0.000000e+00 : f32
    %50 = vector.broadcast %cst_14 : f32 to vector<1x128xf32>
    %51 = arith.maximumf %49, %50 : vector<1x128xf32>
    %52 = vector.extract_strided_slice %1 {offsets = [4, 0], sizes = [1, 128], strides = [1, 1]} : vector<8x128xf32> to vector<1x128xf32>
    %53 = vector.extract_strided_slice %1 {offsets = [5, 0], sizes = [1, 128], strides = [1, 1]} : vector<8x128xf32> to vector<1x128xf32>
    %cst_15 = arith.constant 9.99999974E-6 : f32
    %54 = vector.broadcast %cst_15 : f32 to vector<1x128xf32>
    %55 = arith.addf %51, %54 : vector<1x128xf32>
    %56 = math.rsqrt %55 : vector<1x128xf32>
    %57 = arith.mulf %52, %56 : vector<1x128xf32>
    %58 = arith.mulf %46, %57 : vector<1x128xf32>
    %59 = arith.subf %53, %58 : vector<1x128xf32>
    %60 = vector.broadcast %57 : vector<1x128xf32> to vector<8x128xf32>
    %61 = arith.mulf %39, %60 : vector<8x128xf32>
    %62 = vector.broadcast %59 : vector<1x128xf32> to vector<8x128xf32>
    %63 = arith.addf %61, %62 : vector<8x128xf32>
    %c256 = arith.constant 256 : index
    %c0_16 = arith.constant 0 : index
    %64 = vector.load %arg1[%c256, %c0_16] : memref<520x128xf32, #tpu.memory_space<vmem>>, vector<128x128xf32>
    %65 = vector.extract_strided_slice %1 {offsets = [6, 0], sizes = [1, 128], strides = [1, 1]} : vector<8x128xf32> to vector<1x128xf32>
    %cst_17 = arith.constant dense<0.000000e+00> : vector<8x128xf32>
    %66 = tpu.matmul %63, %64, %cst_17 {dimension_numbers = #tpu.dot_dimension_numbers<[1], [0], [0], [1], [0, 0, 1, 1], [], []>} : vector<8x128xf32>, vector<128x128xf32>, vector<8x128xf32> -> vector<8x128xf32>
    %67 = vector.broadcast %65 : vector<1x128xf32> to vector<8x128xf32>
    %68 = arith.addf %66, %67 : vector<8x128xf32>
    %cst_18 = arith.constant 0.000000e+00 : f32
    %69 = vector.broadcast %cst_18 : f32 to vector<8x128xf32>
    %70 = arith.maximumf %68, %69 : vector<8x128xf32>
    %c384 = arith.constant 384 : index
    %c0_19 = arith.constant 0 : index
    %71 = vector.load %arg1[%c384, %c0_19] : memref<520x128xf32, #tpu.memory_space<vmem>>, vector<128x128xf32>
    %72 = vector.extract_strided_slice %1 {offsets = [7, 0], sizes = [1, 128], strides = [1, 1]} : vector<8x128xf32> to vector<1x128xf32>
    %cst_20 = arith.constant dense<0.000000e+00> : vector<8x128xf32>
    %73 = tpu.matmul %70, %71, %cst_20 {dimension_numbers = #tpu.dot_dimension_numbers<[1], [0], [0], [1], [0, 0, 1, 1], [], []>} : vector<8x128xf32>, vector<128x128xf32>, vector<8x128xf32> -> vector<8x128xf32>
    %74 = vector.broadcast %72 : vector<1x128xf32> to vector<8x128xf32>
    %75 = arith.addf %73, %74 : vector<8x128xf32>
    %c0_21 = arith.constant 0 : index
    %c0_22 = arith.constant 0 : index
    %76 = vector.load %arg2[%c0_21, %c0_22] : memref<8x128xf32, #tpu.memory_space<vmem>>, vector<8x128xf32>
    tpu.vector_store %arg2[%c0_21, %c0_22], %75 {strides = array<i32>} : memref<8x128xf32, #tpu.memory_space<vmem>>, vector<8x128xf32>,
    return
  }
}

</mosaic_0001>

<bundles_post_ra>
// kernel: tpu_custom_call.1
= control target key start
LH: loop header
LB: loop body
LE: loop exit
PB: predicated region body
PF: predicated region fallthrough
CT: control target
= control target key end

     0   :  { %7 = vsyncpa [#allocation3], 0  ;;  %s901_s0 = inlined_call_operand.hbm [shape: f32[8,128], index: 0, kind: input, shape index: {}]   ;;  %s902_s1 = inlined_call_operand.hbm [shape: f32[520,128], index: 1, kind: input, shape index: {}]   ;;  %s903_s2 = inlined_call_operand.hbm [shape: f32[8,128], index: 2, kind: output, shape index: {}]  }
   0x1   :  { %8 = vsyncpa [#allocation6], 0 }
   0x2   :  { %9 = vsyncpa [#allocation4], 0  ;;  %s778_s9 = smov [#allocation2]   ;;  %s779_s11 = smov [#allocation5]  }
   0x3   :  { %s16_s10 = sshll.u32 %s778_s9, 4  ;;  %s25_s12 = sshll.u32 %s779_s11, 4  ;;  %s17_s10 = int_to_ptr.vmem [resolvable:$true] %s16_s10  ;;  %s26_s12 = int_to_ptr.vmem [resolvable:$true] %s25_s12 }
   0x4   :  { %s720_s13 = scalar_lea.vmem %s17_s10, 128  ;;  %p725_p1 = scmp.lt.s32.totalorder %s17_s10, %s17_s10 }
   0x5   :  { %p721_p0 = scmp.ne.s32.totalorder %s17_s10, %s720_s13  ;;  %p726_p2 = scmp.lt.s32.totalorder %s720_s13, %s720_s13 }
   0x7   :  { %p727_p3 = por %p726_p2, %p725_p1 }
   0x9   :  { %p728_p4 = pnand %p727_p3, %p721_p0 }
   0xb   :  { %731 = shalt.err (!%p728_p4)
}
   0xc   :  { %19 = dma.hbm_to_vmem [thread:$0]  %s901_s0, 128, %s17_s10, [#allocation3]  }
   0xd   :  { %s740_s16 = scalar_lea.vmem %s26_s12, 8320  ;;  %p745_p6 = scmp.lt.s32.totalorder %s26_s12, %s26_s12 }
   0xe   :  { %p741_p5 = scmp.ne.s32.totalorder %s26_s12, %s740_s16  ;;  %p746_p7 = scmp.lt.s32.totalorder %s740_s16, %s740_s16 }
  0x10   :  { %p747_p8 = por %p746_p7, %p745_p6 }
  0x12   :  { %p748_p9 = pnand %p747_p8, %p741_p5 }
  0x14   :  { %751 = shalt.err (!%p748_p9)
}
  0x15   :  { %s780_s17 = smov 128   ;;  %s781_s18 = smov 8  }
  0x16   :  { %31 = dma.hbm_to_vmem [thread:$0]  %s902_s1, 8320, %s26_s12, [#allocation6], %s780_s17, %s780_s17, %s781_s18  }
  0x17   :  { %772 = dma.done.wait [#allocation3], 128  }
  0x18   :  { %773 = vsyncadd [#allocation3], 4294967168 }
  0x19   :  { %774 = dma.done.wait [#allocation6], 8320  }
  0x1a   :  { %775 = vsyncadd [#allocation6], 4294958976  ;;  %v782_v0 = vmov 0.0   ;;  %vm783_vm0 = vmmov 0   ;;  %v55_v1 = vld [vmem:[#allocation5 + $0x78] sm:$0xff]  ;;  %v54_v2 = vld [vmem:[#allocation5 + $0x70] sm:$0xff]  ;;  %v56_v34 = vlaneseq }
  0x1b   :  { %561 = vmatprep.subr.mxu0 %v782_v0  ;;  %593 = vmatprep.mubr.msk.f32.mxu0 %vm783_vm0, %v782_v0  ;;  %v53_v3 = vld [vmem:[#allocation5 + $0x68] sm:$0xff]  ;;  %v52_v4 = vld [vmem:[#allocation5 + $0x60] sm:$0xff]  ;;  %v51_v5 = vld [vmem:[#allocation5 + $0x58] sm:$0xff]  ;;  %s784_s0 = smov [#allocation7]  }
  0x1c   :  { %596 = vmatprep.subr.mxu1 %v782_v0  ;;  %628 = vmatprep.mubr.msk.f32.mxu1 %vm783_vm0, %v782_v0  ;;  %v50_v6 = vld [vmem:[#allocation5 + $0x50] sm:$0xff]  ;;  %v49_v7 = vld [vmem:[#allocation5 + $0x48] sm:$0xff]  ;;  %v48_v8 = vld [vmem:[#allocation5 + $0x40] sm:$0xff]  ;;  %v846_v35 = vshrl.u32 %v56_v34, 7  ;;  %s483_s1 = sshll.u32 %s784_s0, 4  ;;  %s484_s1 = int_to_ptr.vmem [resolvable:$true] %s483_s1 }
  0x1d   :  { %562 = vmatpush3.msra.mxu0 %v55_v1  ;;  %v47_v9 = vld [vmem:[#allocation5 + $0x38] sm:$0xff]  ;;  %v46_v10 = vld [vmem:[#allocation5 + $0x30] sm:$0xff]  ;;  %v45_v11 = vld [vmem:[#allocation5 + $0x28] sm:$0xff]  ;;  %s752_s21 = scalar_lea.vmem %s484_s1, 128  ;;  %p757_p11 = scmp.lt.s32.totalorder %s484_s1, %s484_s1 }
  0x1e   :  { %563 = vmatprep.subr.mxu0 %v782_v0  ;;  %v44_v12 = vld [vmem:[#allocation5 + $0x20] sm:$0xff]  ;;  %v43_v13 = vld [vmem:[#allocation5 + $0x18] sm:$0xff]  ;;  %v42_v14 = vld [vmem:[#allocation5 + $0x10] sm:$0xff]  ;;  %v58_v36 = vsub.s32 0, %v846_v35  ;;  %v160_v1 = vsub.s32 1, %v846_v35  ;;  %p753_p10 = scmp.ne.s32.totalorder %s484_s1, %s752_s21  ;;  %p758_p12 = scmp.lt.s32.totalorder %s752_s21, %s752_s21 }
  0x1f   :  { %564 = vmatpush3.msra.mxu0 %v54_v2  ;;  %v41_v15 = vld [vmem:[#allocation5 + $0x8] sm:$0xff]  ;;  %v40_v16 = vld [vmem:[#allocation5] sm:$0xff]  ;;  %v38_v17 = vld [vmem:[#allocation2] sm:$0xff] }
  0x20   :  { %565 = vmatprep.subr.mxu0 %v782_v0  ;;  %v183_v18 = vld [vmem:[#allocation5 + $0xf8] sm:$0xff]  ;;  %v182_v19 = vld [vmem:[#allocation5 + $0xf0] sm:$0xff]  ;;  %v181_v20 = vld [vmem:[#allocation5 + $0xe8] sm:$0xff]  ;;  %p759_p13 = por %p758_p12, %p757_p11 }
  0x21   :  { %566 = vmatpush3.msra.mxu0 %v53_v3  ;;  %597 = vmatpush3.msra.mxu1 %v183_v18  ;;  %v180_v21 = vld [vmem:[#allocation5 + $0xe0] sm:$0xff]  ;;  %v179_v22 = vld [vmem:[#allocation5 + $0xd8] sm:$0xff]  ;;  %v178_v23 = vld [vmem:[#allocation5 + $0xd0] sm:$0xff] }
  0x22   :  { %567 = vmatprep.subr.mxu0 %v782_v0  ;;  %598 = vmatprep.subr.mxu1 %v782_v0  ;;  %v177_v24 = vld [vmem:[#allocation5 + $0xc8] sm:$0xff]  ;;  %v176_v25 = vld [vmem:[#allocation5 + $0xc0] sm:$0xff]  ;;  %v175_v26 = vld [vmem:[#allocation5 + $0xb8] sm:$0xff]  ;;  %p760_p0 = pnand %p759_p13, %p753_p10 }
  0x23   :  { %568 = vmatpush3.msra.mxu0 %v52_v4  ;;  %599 = vmatpush3.msra.mxu1 %v182_v19  ;;  %v174_v27 = vld [vmem:[#allocation5 + $0xb0] sm:$0xff]  ;;  %v173_v28 = vld [vmem:[#allocation5 + $0xa8] sm:$0xff]  ;;  %v172_v29 = vld [vmem:[#allocation5 + $0xa0] sm:$0xff] }
  0x24   :  { %569 = vmatprep.subr.mxu0 %v782_v0  ;;  %600 = vmatprep.subr.mxu1 %v782_v0  ;;  %v171_v30 = vld [vmem:[#allocation5 + $0x98] sm:$0xff]  ;;  %v170_v31 = vld [vmem:[#allocation5 + $0x90] sm:$0xff]  ;;  %v169_v32 = vld [vmem:[#allocation5 + $0x88] sm:$0xff] }
  0x25   :  { %570 = vmatpush3.msra.mxu0 %v51_v5  ;;  %601 = vmatpush3.msra.mxu1 %v181_v20  ;;  %v168_v33 = vld [vmem:[#allocation5 + $0x80] sm:$0xff]  ;;  %v165_v5 = vsub.s32 2, %v846_v35  ;;  %v302_v18 = vld [vmem:[#allocation5 + $0x138] sm:$0xff]  ;;  %v301_v19 = vld [vmem:[#allocation5 + $0x130] sm:$0xff] }
  0x26   :  { %571 = vmatprep.subr.mxu0 %v782_v0  ;;  %602 = vmatprep.subr.mxu1 %v782_v0  ;;  %v849_v37 = vld [vmem:[#allocation5 + $0x200] sm:$0xff]  ;;  %v300_v20 = vld [vmem:[#allocation5 + $0x128] sm:$0xff]  ;;  %v393_v34 = vld [vmem:[#allocation5 + $0x1b8] sm:$0xff] }
  0x27   :  { %572 = vmatpush3.msra.mxu0 %v50_v6  ;;  %603 = vmatpush3.msra.mxu1 %v180_v21  ;;  %v59_v38 = vrot.slane %v849_v37, %v58_v36  ;;  %v299_v21 = vld [vmem:[#allocation5 + $0x120] sm:$0xff]  ;;  %v392_v36 = vld [vmem:[#allocation5 + $0x1b0] sm:$0xff] }
  0x28   :  { %573 = vmatprep.subr.mxu0 %v782_v0  ;;  %604 = vmatprep.subr.mxu1 %v782_v0 }
  0x29   :  { %574 = vmatpush3.msra.mxu0 %v49_v7  ;;  %605 = vmatpush3.msra.mxu1 %v179_v22  ;;  %v298_v22 = vld [vmem:[#allocation5 + $0x118] sm:$0xff] }
  0x2a   :  { %575 = vmatprep.subr.mxu0 %v782_v0  ;;  %606 = vmatprep.subr.mxu1 %v782_v0 }
  0x2b   :  { %576 = vmatpush3.msra.mxu0 %v48_v8  ;;  %607 = vmatpush3.msra.mxu1 %v178_v23  ;;  %v297_v23 = vld [vmem:[#allocation5 + $0x110] sm:$0xff] }
  0x2c   :  { %577 = vmatprep.subr.mxu0 %v782_v0  ;;  %608 = vmatprep.subr.mxu1 %v782_v0 }
  0x2d   :  { %578 = vmatpush3.msra.mxu0 %v47_v9  ;;  %609 = vmatpush3.msra.mxu1 %v177_v24  ;;  %v296_v24 = vld [vmem:[#allocation5 + $0x108] sm:$0xff] }
  0x2e   :  { %579 = vmatprep.subr.mxu0 %v782_v0  ;;  %610 = vmatprep.subr.mxu1 %v782_v0 }
  0x2f   :  { %580 = vmatpush3.msra.mxu0 %v46_v10  ;;  %611 = vmatpush3.msra.mxu1 %v176_v25  ;;  %v310_v10 = vld [vmem:[#allocation5 + $0x178] sm:$0xff]  ;;  %v295_v25 = vld [vmem:[#allocation5 + $0x100] sm:$0xff] }
  0x30   :  { %581 = vmatprep.subr.mxu0 %v782_v0  ;;  %612 = vmatprep.subr.mxu1 %v782_v0 }
  0x31   :  { %582 = vmatpush3.msra.mxu0 %v45_v11  ;;  %613 = vmatpush3.msra.mxu1 %v175_v26  ;;  %v309_v11 = vld [vmem:[#allocation5 + $0x170] sm:$0xff]  ;;  %v401_v26 = vld [vmem:[#allocation5 + $0x1f8] sm:$0xff] }
  0x32   :  { %583 = vmatprep.subr.mxu0 %v782_v0  ;;  %614 = vmatprep.subr.mxu1 %v782_v0 }
  0x33   :  { %584 = vmatpush3.msra.mxu0 %v44_v12  ;;  %615 = vmatpush3.msra.mxu1 %v174_v27  ;;  %v308_v12 = vld [vmem:[#allocation5 + $0x168] sm:$0xff]  ;;  %v400_v27 = vld [vmem:[#allocation5 + $0x1f0] sm:$0xff] }
  0x34   :  { %585 = vmatprep.subr.mxu0 %v782_v0  ;;  %616 = vmatprep.subr.mxu1 %v782_v0 }
  0x35   :  { %586 = vmatpush3.msra.mxu0 %v43_v13  ;;  %617 = vmatpush3.msra.mxu1 %v173_v28  ;;  %v307_v13 = vld [vmem:[#allocation5 + $0x160] sm:$0xff]  ;;  %v399_v28 = vld [vmem:[#allocation5 + $0x1e8] sm:$0xff] }
  0x36   :  { %587 = vmatprep.subr.mxu0 %v782_v0  ;;  %618 = vmatprep.subr.mxu1 %v782_v0 }
  0x37   :  { %588 = vmatpush3.msra.mxu0 %v42_v14  ;;  %619 = vmatpush3.msra.mxu1 %v172_v29  ;;  %v306_v14 = vld [vmem:[#allocation5 + $0x158] sm:$0xff]  ;;  %v398_v29 = vld [vmem:[#allocation5 + $0x1e0] sm:$0xff] }
  0x38   :  { %589 = vmatprep.subr.mxu0 %v782_v0  ;;  %620 = vmatprep.subr.mxu1 %v782_v0 }
  0x39   :  { %590 = vmatpush3.msra.mxu0 %v41_v15  ;;  %621 = vmatpush3.msra.mxu1 %v171_v30  ;;  %v305_v15 = vld [vmem:[#allocation5 + $0x150] sm:$0xff]  ;;  %v397_v30 = vld [vmem:[#allocation5 + $0x1d8] sm:$0xff] }
  0x3a   :  { %591 = vmatprep.subr.mxu0 %v782_v0  ;;  %622 = vmatprep.subr.mxu1 %v782_v0 }
  0x3b   :  { %592 = vmatpush3.msra.mxu0 %v40_v16  ;;  %623 = vmatpush3.msra.mxu1 %v170_v31  ;;  %v304_v16 = vld [vmem:[#allocation5 + $0x148] sm:$0xff]  ;;  %v396_v31 = vld [vmem:[#allocation5 + $0x1d0] sm:$0xff] }
  0x3c   :  { %594 = vmatmul.mubr.f32.vlgmr.msra.gmra.mxu0 %v38_v17  ;;  %631 = vmatprep.subr.mxu0 %v782_v0  ;;  %v303_v17 = vld [vmem:[#allocation5 + $0x140] sm:$0xff] }
  0x3d   :  { %663 = vmatprep.mubr.msk.f32.mxu0 %vm783_vm0, %v782_v0  ;;  %624 = vmatprep.subr.mxu1 %v782_v0 }
  0x3e   :  { %625 = vmatpush3.msra.mxu1 %v169_v32  ;;  %632 = vmatpush3.msra.mxu0 %v310_v10  ;;  %v395_v32 = vld [vmem:[#allocation5 + $0x1c8] sm:$0xff] }
  0x3f   :  { %626 = vmatprep.subr.mxu1 %v782_v0  ;;  %633 = vmatprep.subr.mxu0 %v782_v0 }
  0x40   :  { %627 = vmatpush3.msra.mxu1 %v168_v33  ;;  %634 = vmatpush3.msra.mxu0 %v309_v11  ;;  %v394_v33 = vld [vmem:[#allocation5 + $0x1c0] sm:$0xff] }
  0x41   :  { %666 = vmatprep.subr.mxu1 %v782_v0  ;;  %635 = vmatprep.subr.mxu0 %v782_v0 }
  0x42   :  { %636 = vmatpush3.msra.mxu0 %v308_v12 }
  0x43   :  { %637 = vmatprep.subr.mxu0 %v782_v0 }
  0x44   :  { %638 = vmatpush3.msra.mxu0 %v307_v13 }
  0x45   :  { %639 = vmatprep.subr.mxu0 %v782_v0 }
  0x46   :  { %640 = vmatpush3.msra.mxu0 %v306_v14  ;;  %v388_v14 = vld [vmem:[#allocation5 + $0x190] sm:$0xff] }
  0x47   :  { %641 = vmatprep.subr.mxu0 %v782_v0 }
  0x48   :  { %642 = vmatpush3.msra.mxu0 %v305_v15  ;;  %v387_v15 = vld [vmem:[#allocation5 + $0x188] sm:$0xff] }
  0x49   :  { %643 = vmatprep.subr.mxu0 %v782_v0 }
  0x4a   :  { %644 = vmatpush3.msra.mxu0 %v304_v16  ;;  %v386_v16 = vld [vmem:[#allocation5 + $0x180] sm:$0xff] }
  0x4b   :  { %645 = vmatprep.subr.mxu0 %v782_v0 }
  0x4c   :  { %646 = vmatpush3.msra.mxu0 %v303_v17  ;;  %v313_v17 = vsub.s32 6, %v846_v35 }
  0x4d   :  { %647 = vmatprep.subr.mxu0 %v782_v0 }
  0x4e   :  { %648 = vmatpush3.msra.mxu0 %v302_v18  ;;  %v314_v18 = vrot.slane %v849_v37, %v313_v17 }
  0x4f   :  { %649 = vmatprep.subr.mxu0 %v782_v0 }
  0x50   :  { %650 = vmatpush3.msra.mxu0 %v301_v19 }
  0x51   :  { %651 = vmatprep.subr.mxu0 %v782_v0 }
  0x52   :  { %652 = vmatpush3.msra.mxu0 %v300_v20 }
  0x53   :  { %653 = vmatprep.subr.mxu0 %v782_v0 }
  0x54   :  { %654 = vmatpush3.msra.mxu0 %v299_v21 }
  0x55   :  { %655 = vmatprep.subr.mxu0 %v782_v0 }
  0x56   :  { %656 = vmatpush3.msra.mxu0 %v298_v22 }
  0x57   :  { %657 = vmatprep.subr.mxu0 %v782_v0 }
  0x58   :  { %658 = vmatpush3.msra.mxu0 %v297_v23  ;;  %v404_v23 = vsub.s32 7, %v846_v35 }
  0x59   :  { %659 = vmatprep.subr.mxu0 %v782_v0 }
  0x5a   :  { %660 = vmatpush3.msra.mxu0 %v296_v24  ;;  %v405_v24 = vrot.slane %v849_v37, %v404_v23 }
  0x5b   :  { %661 = vmatprep.subr.mxu0 %v782_v0 }
  0x5c   :  { %662 = vmatpush3.msra.mxu0 %v295_v25 }
  0xfc   :  { %v126_v39 = vpop.f32.mrf.mxu0 }
  0xfd   :  { %v127_v40 = vadd.f32 %v126_v39, %v59_v38  ;;  %v391_v38 = vld [vmem:[#allocation5 + $0x1a8] sm:$0xff]  ;;  %v390_v39 = vld [vmem:[#allocation5 + $0x1a0] sm:$0xff] }
  0xfe   :  { %v595_v41 = vpop.f32.mrf.mxu0 }
  0xff   :  { %v130_v42 = vmax.f32 %v127_v40, 0.0  ;;  %v389_v40 = vld [vmem:[#allocation5 + $0x198] sm:$0xff]  ;;  %v186_v41 = vsub.s32 3, %v846_v35 }
 0x101   :  { %v131_v43 = vmul.f32 %v130_v42, %v130_v42  ;;  %v132_v44 = vrot.slane %v130_v42, 4 }
 0x103   :  { %v133_v45 = vadd.f32 %v132_v44, %v130_v42  ;;  %v138_v46 = vrot.slane %v131_v43, 4 }
 0x105   :  { %v134_v47 = vrot.slane %v133_v45, 2  ;;  %v139_v48 = vadd.f32 %v138_v46, %v131_v43 }
 0x107   :  { %v135_v49 = vadd.f32 %v134_v47, %v133_v45  ;;  %v140_v50 = vrot.slane %v139_v48, 2 }
 0x109   :  { %v136_v51 = vrot.slane %v135_v49, 1  ;;  %v141_v52 = vadd.f32 %v140_v50, %v139_v48 }
 0x10b   :  { %v142_v53 = vrot.slane %v141_v52, 1  ;;  %v137_v54 = vadd.f32 %v136_v51, %v135_v49 }
 0x10d   :  { %v143_v55 = vadd.f32 %v142_v53, %v141_v52  ;;  %v145_v56 = vmul.f32 0.125, %v137_v54 }
 0x10f   :  { %v146_v57 = vmul.f32 0.125, %v143_v55  ;;  %v147_v58 = vmul.f32 %v145_v56, %v145_v56 }
 0x111   :  { %v148_v59 = vsub.f32 %v146_v57, %v147_v58 }
 0x113   :  { %v149_v60 = vmax.f32 %v148_v59, 0.0 }
 0x115   :  { %v150_v61 = vadd.f32 1e-05, %v149_v60 }
 0x117   :  { %708 = vrsqrt.f32 %v150_v61 }
 0x124   :  { %v709_v62 = vpop.eup %708 }
 0x125   :  { %v152_v63 = vmul.f32 %v709_v62, %v849_v37 }
 0x127   :  { %v153_v2 = vmul.f32 %v152_v63, %v145_v56  ;;  %v161_v4 = vrot.slane %v152_v63, %v160_v1 }
 0x129   :  { %v155_v3 = vrot.slane %v153_v2, 7  ;;  %v162_v7 = vmul.f32 %v161_v4, %v130_v42  ;;  %v187_v42 = vrot.slane %v849_v37, %v186_v41 }
 0x12b   :  { %v157_v6 = vsub.f32 %v849_v37, %v155_v3 }
 0x12d   :  { %v166_v8 = vrot.slane %v157_v6, %v165_v5  ;;  %v287_v5 = vsub.s32 4, %v846_v35 }
 0x12f   :  { %v167_v9 = vadd.f32 %v166_v8, %v162_v7 }
 0x131   :  { %629 = vmatmul.mubr.f32.vlgmr.msra.gmra.mxu1 %v167_v9  ;;  %v292_v9 = vsub.s32 5, %v846_v35 }
 0x132   :  { %698 = vmatprep.mubr.msk.f32.mxu1 %vm783_vm0, %v782_v0  ;;  %667 = vmatpush3.msra.mxu1 %v401_v26 }
 0x133   :  { %668 = vmatprep.subr.mxu1 %v782_v0 }
 0x134   :  { %669 = vmatpush3.msra.mxu1 %v400_v27 }
 0x135   :  { %670 = vmatprep.subr.mxu1 %v782_v0 }
 0x136   :  { %671 = vmatpush3.msra.mxu1 %v399_v28 }
 0x137   :  { %672 = vmatprep.subr.mxu1 %v782_v0 }
 0x138   :  { %673 = vmatpush3.msra.mxu1 %v398_v29 }
 0x139   :  { %674 = vmatprep.subr.mxu1 %v782_v0 }
 0x13a   :  { %675 = vmatpush3.msra.mxu1 %v397_v30 }
 0x13b   :  { %676 = vmatprep.subr.mxu1 %v782_v0 }
 0x13c   :  { %677 = vmatpush3.msra.mxu1 %v396_v31 }
 0x13d   :  { %678 = vmatprep.subr.mxu1 %v782_v0 }
 0x13e   :  { %679 = vmatpush3.msra.mxu1 %v395_v32 }
 0x13f   :  { %680 = vmatprep.subr.mxu1 %v782_v0 }
 0x140   :  { %681 = vmatpush3.msra.mxu1 %v394_v33 }
 0x141   :  { %682 = vmatprep.subr.mxu1 %v782_v0 }
 0x142   :  { %683 = vmatpush3.msra.mxu1 %v393_v34 }
 0x143   :  { %684 = vmatprep.subr.mxu1 %v782_v0 }
 0x144   :  { %685 = vmatpush3.msra.mxu1 %v392_v36 }
 0x145   :  { %686 = vmatprep.subr.mxu1 %v782_v0 }
 0x146   :  { %687 = vmatpush3.msra.mxu1 %v391_v38 }
 0x147   :  { %688 = vmatprep.subr.mxu1 %v782_v0 }
 0x148   :  { %689 = vmatpush3.msra.mxu1 %v390_v39 }
 0x149   :  { %690 = vmatprep.subr.mxu1 %v782_v0 }
 0x14a   :  { %691 = vmatpush3.msra.mxu1 %v389_v40 }
 0x14b   :  { %692 = vmatprep.subr.mxu1 %v782_v0 }
 0x14c   :  { %693 = vmatpush3.msra.mxu1 %v388_v14 }
 0x14d   :  { %694 = vmatprep.subr.mxu1 %v782_v0 }
 0x14e   :  { %695 = vmatpush3.msra.mxu1 %v387_v15 }
 0x14f   :  { %696 = vmatprep.subr.mxu1 %v782_v0 }
 0x150   :  { %697 = vmatpush3.msra.mxu1 %v386_v16 }
 0x1f1   :  { %v254_v43 = vpop.f32.mrf.mxu1 }
 0x1f2   :  { %v255_v44 = vadd.f32 %v254_v43, %v187_v42 }
 0x1f3   :  { %v630_v45 = vpop.f32.mrf.mxu1 }
 0x1f4   :  { %v258_v46 = vmax.f32 %v255_v44, 0.0 }
 0x1f6   :  { %v259_v47 = vmul.f32 %v258_v46, %v258_v46  ;;  %v260_v48 = vrot.slane %v258_v46, 4 }
 0x1f8   :  { %v261_v49 = vadd.f32 %v260_v48, %v258_v46  ;;  %v266_v50 = vrot.slane %v259_v47, 4 }
 0x1fa   :  { %v262_v51 = vrot.slane %v261_v49, 2  ;;  %v267_v52 = vadd.f32 %v266_v50, %v259_v47 }
 0x1fc   :  { %v263_v53 = vadd.f32 %v262_v51, %v261_v49  ;;  %v268_v54 = vrot.slane %v267_v52, 2 }
 0x1fe   :  { %v264_v55 = vrot.slane %v263_v53, 1  ;;  %v269_v56 = vadd.f32 %v268_v54, %v267_v52 }
 0x200   :  { %v265_v57 = vadd.f32 %v264_v55, %v263_v53  ;;  %v270_v58 = vrot.slane %v269_v56, 1 }
 0x202   :  { %v271_v59 = vadd.f32 %v270_v58, %v269_v56  ;;  %v272_v60 = vmul.f32 0.125, %v265_v57 }
 0x204   :  { %v273_v61 = vmul.f32 0.125, %v271_v59  ;;  %v274_v62 = vmul.f32 %v272_v60, %v272_v60 }
 0x206   :  { %v275_v63 = vsub.f32 %v273_v61, %v274_v62 }
 0x208   :  { %v276_v1 = vmax.f32 %v275_v63, 0.0 }
 0x20a   :  { %v277_v2 = vadd.f32 1e-05, %v276_v1 }
 0x20c   :  { %710 = vrsqrt.f32 %v277_v2 }
 0x219   :  { %v711_v3 = vpop.eup %710 }
 0x21a   :  { %v279_v4 = vmul.f32 %v711_v3, %v849_v37 }
 0x21c   :  { %v280_v6 = vmul.f32 %v279_v4, %v272_v60  ;;  %v288_v7 = vrot.slane %v279_v4, %v287_v5 }
 0x21e   :  { %v282_v8 = vrot.slane %v280_v6, 7  ;;  %v289_v11 = vmul.f32 %v288_v7, %v258_v46 }
 0x220   :  { %v284_v10 = vsub.f32 %v849_v37, %v282_v8 }
 0x222   :  { %v293_v12 = vrot.slane %v284_v10, %v292_v9 }
 0x224   :  { %v294_v13 = vadd.f32 %v293_v12, %v289_v11 }
 0x226   :  { %664 = vmatmul.mubr.f32.vlgmr.msra.gmra.mxu0 %v294_v13 }
 0x2e6   :  { %v381_v19 = vpop.f32.mrf.mxu0 }
 0x2e7   :  { %v382_v20 = vadd.f32 %v381_v19, %v314_v18 }
 0x2e8   :  { %v665_v21 = vpop.f32.mrf.mxu0 }
 0x2e9   :  { %v385_v22 = vmax.f32 %v382_v20, 0.0 }
 0x2eb   :  { %699 = vmatmul.mubr.f32.vlgmr.msra.gmra.mxu1 %v385_v22 }
 0x3ab   :  { %v472_v25 = vpop.f32.mrf.mxu1 }
 0x3ac   :  { %v473_v26 = vadd.f32 %v472_v25, %v405_v24 }
 0x3ad   :  { %v700_v0 = vpop.f32.mrf.mxu1 }
 0x3ae   :  { %476 = vst [vmem:[#allocation7] sm:$0xff] %v473_v26 }
 0x3af   :  { %763 = shalt.err (!%p760_p0)
}
 0x3b0   :  { %486 = dma.vmem_to_hbm [thread:$0]  %s484_s1, 128, %s903_s2, [#allocation4]  }
 0x3b1   :  { %776 = dma.done.wait [#allocation4], 128  }
 0x3b2   :  { %777 = vsyncadd [#allocation4], 4294967168 }
 0x3b3   :  { %490 = vsyncpa [#allocation3], 1 }
 0x3b4   :  { %491 = vsyncpa [#allocation6], 1 }
 0x3b5   :  { %492 = vsyncpa [#allocation4], 1 }

</bundles_post_ra>
